<compile_context>
chip_gen: v7x
topology: tpu7x:2x2x1
jax: 0.10.0
libtpu: 0.0.40
codegen_flags: <defaults>
</compile_context>

<pallas_src>
import jax
import jax.numpy as jnp
from jax.experimental import pallas as pl
from jax.experimental.pallas import tpu as pltpu


def _round_up(x, m):
    return ((x + m - 1) // m) * m


def _vmem_cap_bytes():
    """Usable VMEM budget: physical capacity minus ~25% headroom for compiler scratch."""
    phys = 64 * 1024 * 1024  # conservative default (v7x per-TC VMEM)
    try:
        info = pltpu.get_tpu_info()
        cap = getattr(info, "vmem_capacity_bytes", None)
        if cap:
            phys = int(cap)
    except Exception:
        pass
    return int(phys * 3 // 4)


# ------------------------------ kernels -------------------------------------

def ffn_resident_kernel(x_ref, w1_ref, b1_ref, w2_ref, b2_ref, o_ref):
    # x_ref:  (tile_n, d_model_p)   original dtype (cast to compute dtype on VPU)
    # w1_ref: (d_model_p, d_ff_p)   compute dtype, resident (constant index map)
    # b1_ref: (1, d_ff_p)           f32
    # w2_ref: (d_ff_p, d_model_p)   compute dtype, resident
    # b2_ref: (1, d_model_p)        f32
    # o_ref:  (tile_n, d_model_p)   original dtype
    x = x_ref[...].astype(w1_ref.dtype)
    h = jnp.dot(x, w1_ref[...], preferred_element_type=jnp.float32)
    h = jnp.maximum(h + b1_ref[...], 0.0)
    # TODO(synk): dropout implemented as identity (eval-mode semantics); a
    # training-mode dropout would mask h via pltpu.prng_seed + pltpu.prng_random_bits.
    acc = jnp.dot(h.astype(w2_ref.dtype), w2_ref[...],
                  preferred_element_type=jnp.float32)
    o_ref[...] = (acc + b2_ref[...]).astype(o_ref.dtype)


def ffn_streamed_kernel(x_ref, w1_ref, b1_ref, w2_ref, b2_ref, o_ref, acc_ref):
    # Fallback for very large d_ff: stream (d_model_p, tile_ff) / (tile_ff, d_model_p)
    # weight slices over a trailing "arbitrary" reduction axis; accumulate the
    # partial w_2 products in a (tile_n, d_model_p) f32 VMEM scratch.
    k = pl.program_id(1)

    @pl.when(k == 0)
    def _init():
        acc_ref[...] = jnp.zeros_like(acc_ref)

    x = x_ref[...].astype(w1_ref.dtype)
    h = jnp.dot(x, w1_ref[...], preferred_element_type=jnp.float32)
    h = jnp.maximum(h + b1_ref[...], 0.0)
    # TODO(synk): dropout identity here too (eval-mode semantics).
    acc_ref[...] += jnp.dot(h.astype(w2_ref.dtype), w2_ref[...],
                            preferred_element_type=jnp.float32)

    @pl.when(k == pl.num_programs(1) - 1)
    def _finalize():
        o_ref[...] = (acc_ref[...] + b2_ref[...]).astype(o_ref.dtype)


# ------------------------------ wrapper --------------------------------------

def prepare_ffn_params(w1, b1, w2, b2, *, compute_dtype=jnp.bfloat16):
    """Pad (to multiples of 128) and cast the FFN parameters ONCE (init-time).

    w1: [d_model, d_ff], b1: [d_ff], w2: [d_ff, d_model], b2: [d_model].
    compute_dtype is the MXU operand dtype (bf16 recommended); accumulation,
    bias adds and ReLU are always f32.
    """
    d_model, d_ff = w1.shape
    assert w2.shape == (d_ff, d_model)
    assert b1.shape == (d_ff,) and b2.shape == (d_model,)
    d_model_p = _round_up(d_model, 128)
    d_ff_p = _round_up(d_ff, 128)
    w1_p = jnp.pad(jnp.asarray(w1, compute_dtype),
                   ((0, d_model_p - d_model), (0, d_ff_p - d_ff)))
    w2_p = jnp.pad(jnp.asarray(w2, compute_dtype),
                   ((0, d_ff_p - d_ff), (0, d_model_p - d_model)))
    b1_p = jnp.pad(jnp.asarray(b1, jnp.float32), (0, d_ff_p - d_ff)).reshape(1, d_ff_p)
    b2_p = jnp.pad(jnp.asarray(b2, jnp.float32), (0, d_model_p - d_model)).reshape(1, d_model_p)
    return dict(w1=w1_p, b1=b1_p, w2=w2_p, b2=b2_p,
                d_model=d_model, d_ff=d_ff,
                d_model_p=d_model_p, d_ff_p=d_ff_p,
                compute_dtype=jnp.dtype(compute_dtype))


def positionwise_ffn(x, params, *, tile_n=512, tile_ff=None):
    """x: [B, S, d_model]; params: output of prepare_ffn_params()."""
    orig_dtype = x.dtype
    B, S, d_model = x.shape
    assert d_model == params["d_model"]
    d_model_p, d_ff_p = params["d_model_p"], params["d_ff_p"]
    cdt = params["compute_dtype"]
    itm_c = cdt.itemsize
    itm_x = jnp.dtype(orig_dtype).itemsize
    itm_o = itm_x

    N = B * S
    ROW_ALIGN = 16                                    # bf16 packs 2 rows per sublane
    tile_n = max(ROW_ALIGN, min(tile_n, _round_up(N, ROW_ALIGN)))
    if N >= 2 * ROW_ALIGN:
        # Keep >= 2 row blocks so v7x's two TensorCores both get work.
        tile_n = min(tile_n, _round_up((N + 1) // 2, ROW_ALIGN))
    N_p = _round_up(N, tile_n)
    n_row_blocks = N_p // tile_n

    x2 = x.reshape(N, d_model)
    if (N_p, d_model_p) != (N, d_model):
        x2 = jnp.pad(x2, ((0, N_p - N), (0, d_model_p - d_model)))

    vmem_cap = _vmem_cap_bytes()

    def resident_footprint(tn):
        return (2 * 2 * d_model_p * d_ff_p * itm_c            # W1 + W2 (double-buffer counted)
                + 2 * 8 * d_ff_p * 4 + 2 * 8 * d_model_p * 4  # biases (sublane padded)
                + 2 * tn * d_model_p * itm_x                  # x tile
                + 2 * tn * d_model_p * itm_o                  # out tile
                + tn * d_ff_p * 4 + tn * d_model_p * 4)       # h / acc live values

    def streamed_footprint(tn, tf):
        return (2 * d_model_p * tf * itm_c + 2 * tf * d_model_p * itm_c
                + 2 * 8 * tf * 4 + 2 * 8 * d_model_p * 4
                + 2 * tn * d_model_p * itm_x + 2 * tn * d_model_p * itm_o
                + tn * d_model_p * 4                          # f32 accumulator scratch
                + tn * tf * 4)                                # h intermediate

    want_resident = tile_ff is None or tile_ff >= d_ff_p
    resident = want_resident and resident_footprint(tile_n) <= vmem_cap

    w_bytes = (params["w1"].size + params["w2"].size) * itm_c
    b_bytes = (params["b1"].size + params["b2"].size) * 4
    io_bytes = N_p * d_model_p * (itm_x + itm_o)
    flops = 4 * N_p * d_model_p * d_ff_p

    if resident:
        footprint = resident_footprint(tile_n)
        vmem_limit = int(min(vmem_cap, max(footprint + footprint // 4, 32 * 1024 * 1024)))
        cost = pl.CostEstimate(flops=flops, transcendentals=0,
                               bytes_accessed=int(io_bytes + w_bytes + b_bytes))
        out = pl.pallas_call(
            ffn_resident_kernel,
            out_shape=jax.ShapeDtypeStruct((N_p, d_model_p), orig_dtype),
            grid_spec=pltpu.PrefetchScalarGridSpec(
                num_scalar_prefetch=0,
                grid=(n_row_blocks,),
                in_specs=[
                    pl.BlockSpec((tile_n, d_model_p), lambda i: (i, 0)),    # x rows
                    pl.BlockSpec((d_model_p, d_ff_p), lambda i: (0, 0)),    # W1 (resident)
                    pl.BlockSpec((1, d_ff_p), lambda i: (0, 0)),            # b1
                    pl.BlockSpec((d_ff_p, d_model_p), lambda i: (0, 0)),    # W2 (resident)
                    pl.BlockSpec((1, d_model_p), lambda i: (0, 0)),         # b2
                ],
                out_specs=pl.BlockSpec((tile_n, d_model_p), lambda i: (i, 0)),
            ),
            compiler_params=pltpu.CompilerParams(
                dimension_semantics=("parallel",),
                vmem_limit_bytes=vmem_limit),
            cost_estimate=cost,
        )(x2, params["w1"], params["b1"], params["w2"], params["b2"])
    else:
        # Pick tile_ff: a multiple of 128 dividing d_ff_p whose footprint fits.
        if tile_ff is None:
            tile_ff = min(d_ff_p, 2048)
        tile_ff = max(128, min(_round_up(tile_ff, 128), d_ff_p))
        while tile_ff > 128 and (d_ff_p % tile_ff != 0 or
                                 streamed_footprint(tile_n, tile_ff) > vmem_cap):
            tile_ff -= 128
        footprint = streamed_footprint(tile_n, tile_ff)
        vmem_limit = int(min(vmem_cap, max(footprint + footprint // 4, 32 * 1024 * 1024)))
        n_k = d_ff_p // tile_ff
        cost = pl.CostEstimate(
            flops=flops, transcendentals=0,
            bytes_accessed=int(io_bytes + n_row_blocks * (w_bytes + b_bytes)))
        out = pl.pallas_call(
            ffn_streamed_kernel,
            out_shape=jax.ShapeDtypeStruct((N_p, d_model_p), orig_dtype),
            grid_spec=pltpu.PrefetchScalarGridSpec(
                num_scalar_prefetch=0,
                grid=(n_row_blocks, n_k),
                in_specs=[
                    pl.BlockSpec((tile_n, d_model_p), lambda i, k: (i, 0)),   # x rows
                    pl.BlockSpec((d_model_p, tile_ff), lambda i, k: (0, k)),  # W1 slice
                    pl.BlockSpec((1, tile_ff), lambda i, k: (0, k)),          # b1 slice
                    pl.BlockSpec((tile_ff, d_model_p), lambda i, k: (k, 0)),  # W2 slice
                    pl.BlockSpec((1, d_model_p), lambda i, k: (0, 0)),        # b2
                ],
                out_specs=pl.BlockSpec((tile_n, d_model_p), lambda i, k: (i, 0)),
                scratch_shapes=[pltpu.VMEM((tile_n, d_model_p), jnp.float32)],
            ),
            compiler_params=pltpu.CompilerParams(
                dimension_semantics=("parallel", "arbitrary"),
                vmem_limit_bytes=vmem_limit),
            cost_estimate=cost,
        )(x2, params["w1"], params["b1"], params["w2"], params["b2"])

    return out[:N, :d_model].reshape(B, S, d_model)


# ------------------------------ test harness ---------------------------------

def init_params(key, d_model, d_ff, dtype=jnp.float32):
    """Deterministic init mirroring nn.Linear's U(-1/sqrt(fan_in), +1/sqrt(fan_in))."""
    k1, k2, k3, k4 = jax.random.split(key, 4)
    lim1 = 1.0 / jnp.sqrt(d_model)
    lim2 = 1.0 / jnp.sqrt(d_ff)
    # stored pre-transposed: [in, out]
    w1 = jax.random.uniform(k1, (d_model, d_ff), dtype, -lim1, lim1)
    b1 = jax.random.uniform(k2, (d_ff,), dtype, -lim1, lim1)
    w2 = jax.random.uniform(k3, (d_ff, d_model), dtype, -lim2, lim2)
    b2 = jax.random.uniform(k4, (d_model,), dtype, -lim2, lim2)
    return w1, b1, w2, b2


def _ref_ffn(x, w1, b1, w2, b2):
    return jnp.maximum(x @ w1 + b1, 0.0) @ w2 + b2


if __name__ == "__main__":
    key = jax.random.PRNGKey(0)
    kx, kp, kx2, kp2 = jax.random.split(key, 4)

    # Small, lane-aligned case.
    batch, seq, d_model, d_ff = 2, 8, 128, 256
    x = jax.random.normal(kx, (batch, seq, d_model), dtype=jnp.float32)
    w1, b1, w2, b2 = init_params(kp, d_model, d_ff)
    ref = _ref_ffn(x, w1, b1, w2, b2)

    # f32 MXU operands (tight check), resident-weight fast path.
    params_f32 = prepare_ffn_params(w1, b1, w2, b2, compute_dtype=jnp.float32)
    out_f32 = jax.block_until_ready(positionwise_ffn(x, params_f32))
    assert out_f32.shape == (batch, seq, d_model)
    assert jnp.allclose(out_f32, ref, atol=1e-5, rtol=1e-5)

    # bf16 MXU operands (recommended fast path; f32 accumulation) -> looser check
    # against the f32 reference (operands are truncated to bf16 before the MXU).
    params_bf16 = prepare_ffn_params(w1, b1, w2, b2)   # compute_dtype defaults to bf16
    out_bf16 = jax.block_until_ready(positionwise_ffn(x, params_bf16))
    assert out_bf16.shape == (batch, seq, d_model)
    assert jnp.allclose(out_bf16, ref, atol=5e-2, rtol=5e-2)

    # Force the streamed (d_ff reduction axis) fallback path.
    out_stream = jax.block_until_ready(positionwise_ffn(x, params_f32, tile_ff=128))
    assert jnp.allclose(out_stream, ref, atol=1e-5, rtol=1e-5)

    # Unaligned shapes exercise the padding / tail path.
    b2_, s2_, dm2, dff2 = 2, 7, 96, 192
    x_r = jax.random.normal(kx2, (b2_, s2_, dm2), dtype=jnp.float32)
    pr = init_params(kp2, dm2, dff2)
    params_r = prepare_ffn_params(*pr, compute_dtype=jnp.float32)
    out_r = jax.block_until_ready(positionwise_ffn(x_r, params_r))
    assert out_r.shape == (b2_, s2_, dm2)
    assert jnp.allclose(out_r, _ref_ffn(x_r, *pr), atol=1e-5, rtol=1e-5)

    print("KERNEL_OK")
</pallas_src>

<mosaic_0001>
module attributes {stable_mosaic.version = 11 : i64} {
  func.func @ffn_resident_kernel(%arg0: i32, %arg1: memref<16x128xf32, #tpu.memory_space<vmem>>, %arg2: memref<128x256xf32, #tpu.memory_space<vmem>>, %arg3: memref<1x256xf32, #tpu.memory_space<vmem>>, %arg4: memref<256x128xf32, #tpu.memory_space<vmem>>, %arg5: memref<1x128xf32, #tpu.memory_space<vmem>>, %arg6: memref<16x128xf32, #tpu.memory_space<vmem>>) attributes {dimension_semantics = [#tpu.dimension_semantics<parallel>], iteration_bounds = array<i64: 1>, scalar_prefetch = 0 : i64, scratch_operands = 0 : i64, tpu.core_type = #tpu.core_type<tc>, window_params = [{transform_indices = @transform_0, window_bounds = array<i64: 16, 128>}, {pipeline_mode = #tpu.pipeline_mode<synchronous>, transform_indices = @transform_1, window_bounds = array<i64: 128, 256>}, {pipeline_mode = #tpu.pipeline_mode<synchronous>, transform_indices = @transform_2, window_bounds = array<i64: 1, 256>}, {pipeline_mode = #tpu.pipeline_mode<synchronous>, transform_indices = @transform_3, window_bounds = array<i64: 256, 128>}, {pipeline_mode = #tpu.pipeline_mode<synchronous>, transform_indices = @transform_4, window_bounds = array<i64: 1, 128>}, {transform_indices = @transform_5, window_bounds = array<i64: 16, 128>}]} {
    %c0 = arith.constant 0 : index
    %c0_0 = arith.constant 0 : index
    %0 = vector.load %arg1[%c0, %c0_0] : memref<16x128xf32, #tpu.memory_space<vmem>>, vector<16x128xf32>
    %c0_1 = arith.constant 0 : index
    %c0_2 = arith.constant 0 : index
    %1 = vector.load %arg2[%c0_1, %c0_2] : memref<128x256xf32, #tpu.memory_space<vmem>>, vector<128x256xf32>
    %cst = arith.constant dense<0.000000e+00> : vector<16x256xf32>
    %2 = tpu.matmul %0, %1, %cst {dimension_numbers = #tpu.dot_dimension_numbers<[1], [0], [0], [1], [0, 0, 1, 1], [], []>} : vector<16x128xf32>, vector<128x256xf32>, vector<16x256xf32> -> vector<16x256xf32>
    %c0_3 = arith.constant 0 : index
    %c0_4 = arith.constant 0 : index
    %3 = vector.load %arg3[%c0_3, %c0_4] : memref<1x256xf32, #tpu.memory_space<vmem>>, vector<1x256xf32>
    %4 = vector.broadcast %3 : vector<1x256xf32> to vector<16x256xf32>
    %5 = arith.addf %2, %4 : vector<16x256xf32>
    %cst_5 = arith.constant 0.000000e+00 : f32
    %6 = vector.broadcast %cst_5 : f32 to vector<16x256xf32>
    %7 = arith.maximumf %5, %6 : vector<16x256xf32>
    %c0_6 = arith.constant 0 : index
    %c0_7 = arith.constant 0 : index
    %8 = vector.load %arg4[%c0_6, %c0_7] : memref<256x128xf32, #tpu.memory_space<vmem>>, vector<256x128xf32>
    %cst_8 = arith.constant dense<0.000000e+00> : vector<16x128xf32>
    %9 = tpu.matmul %7, %8, %cst_8 {dimension_numbers = #tpu.dot_dimension_numbers<[1], [0], [0], [1], [0, 0, 1, 1], [], []>} : vector<16x256xf32>, vector<256x128xf32>, vector<16x128xf32> -> vector<16x128xf32>
    %c0_9 = arith.constant 0 : index
    %c0_10 = arith.constant 0 : index
    %10 = vector.load %arg5[%c0_9, %c0_10] : memref<1x128xf32, #tpu.memory_space<vmem>>, vector<1x128xf32>
    %11 = vector.broadcast %10 : vector<1x128xf32> to vector<16x128xf32>
    %12 = arith.addf %9, %11 : vector<16x128xf32>
    %c0_11 = arith.constant 0 : index
    %c0_12 = arith.constant 0 : index
    %13 = vector.load %arg6[%c0_11, %c0_12] : memref<16x128xf32, #tpu.memory_space<vmem>>, vector<16x128xf32>
    tpu.vector_store %arg6[%c0_11, %c0_12], %12 {strides = array<i32>} : memref<16x128xf32, #tpu.memory_space<vmem>>, vector<16x128xf32>,
    return
  }
  func.func @transform_0(%arg0: i32) -> (i32, i32) {
    %c0_i32 = arith.constant 0 : i32
    %c0_i32_0 = arith.constant 0 : i32
    return %arg0, %c0_i32 : i32, i32
  }
  func.func @transform_1(%arg0: i32) -> (i32, i32) {
    %c0_i32 = arith.constant 0 : i32
    %c0_i32_0 = arith.constant 0 : i32
    %c0_i32_1 = arith.constant 0 : i32
    return %c0_i32, %c0_i32_0 : i32, i32
  }
  func.func @transform_2(%arg0: i32) -> (i32, i32) {
    %c0_i32 = arith.constant 0 : i32
    %c0_i32_0 = arith.constant 0 : i32
    %c0_i32_1 = arith.constant 0 : i32
    return %c0_i32, %c0_i32_0 : i32, i32
  }
  func.func @transform_3(%arg0: i32) -> (i32, i32) {
    %c0_i32 = arith.constant 0 : i32
    %c0_i32_0 = arith.constant 0 : i32
    %c0_i32_1 = arith.constant 0 : i32
    return %c0_i32, %c0_i32_0 : i32, i32
  }
  func.func @transform_4(%arg0: i32) -> (i32, i32) {
    %c0_i32 = arith.constant 0 : i32
    %c0_i32_0 = arith.constant 0 : i32
    %c0_i32_1 = arith.constant 0 : i32
    return %c0_i32, %c0_i32_0 : i32, i32
  }
  func.func @transform_5(%arg0: i32) -> (i32, i32) {
    %c0_i32 = arith.constant 0 : i32
    %c0_i32_0 = arith.constant 0 : i32
    return %arg0, %c0_i32 : i32, i32
  }
}

</mosaic_0001>

<bundles_post_ra>
// kernel: tpu_custom_call.1
= control target key start
LH: loop header
LB: loop body
LE: loop exit
PB: predicated region body
PF: predicated region fallthrough
CT: control target
= control target key end

     0   :  { %10 = vsyncpa [#allocation3], 0  ;;  %s633_s0 = inlined_call_operand.hbm [shape: f32[16,128], index: 0, kind: input, shape index: {}]   ;;  %s634_s1 = inlined_call_operand.hbm [shape: f32[128,256], index: 1, kind: input, shape index: {}]   ;;  %s635_s2 = inlined_call_operand.vmem [shape: f32[1,256], index: 2, kind: input, shape index: {}]   ;;  %s636_s3 = inlined_call_operand.hbm [shape: f32[256,128], index: 3, kind: input, shape index: {}]   ;;  %s637_s4 = inlined_call_operand.vmem [shape: f32[1,128], index: 4, kind: input, shape index: {}]   ;;  %s638_s5 = inlined_call_operand.hbm [shape: f32[16,128], index: 5, kind: output, shape index: {}]  }
   0x1   :  { %11 = vsyncpa [#allocation6], 0 }
   0x2   :  { %12 = vsyncpa [#allocation4], 0  ;;  %s529_s18 = smov [#allocation5]   ;;  %s435_s22 = scalar_lea.hbm %s634_s1, 4096 }
   0x3   :  { %s30_s19 = sshll.u32 %s529_s18, 4  ;;  %p436_p0 = scmp.ne.s32.totalorder %s634_s1, %s435_s22  ;;  %s31_s19 = int_to_ptr.vmem [resolvable:$true] %s30_s19 }
   0x4   :  { %p439_p1 = scmp.lt.u32.totalorder %s435_s22, %s634_s1 }
   0x6   :  { %p441_p2 = pnand %p439_p1, %p436_p0 }
   0x8   :  { %444 = shalt.err (!%p441_p2)
}
   0x9   :  { %s445_s27 = scalar_lea.vmem %s31_s19, 4096  ;;  %p450_p4 = scmp.lt.s32.totalorder %s31_s19, %s31_s19 }
   0xa   :  { %p446_p3 = scmp.ne.s32.totalorder %s31_s19, %s445_s27  ;;  %p451_p5 = scmp.lt.s32.totalorder %s445_s27, %s445_s27 }
   0xc   :  { %p452_p6 = por %p451_p5, %p450_p4 }
   0xe   :  { %p453_p7 = pnand %p452_p6, %p446_p3 }
  0x10   :  { %456 = shalt.err (!%p453_p7)
}
  0x11   :  { %s530_s28 = smov 256   ;;  %s531_s29 = smov 16  }
  0x12   :  { %36 = dma.hbm_to_vmem [thread:$0]  %s634_s1, 4096, %s31_s19, [#allocation6], %s530_s28, %s530_s28, %s531_s29  }
  0x13   :  { %s532_s7 = smov [#allocation2]   ;;  %s457_s11 = scalar_lea.hbm %s633_s0, 256 }
  0x14   :  { %s18_s8 = sshll.u32 %s532_s7, 4  ;;  %p458_p8 = scmp.ne.s32.totalorder %s633_s0, %s457_s11  ;;  %s19_s8 = int_to_ptr.vmem [resolvable:$true] %s18_s8 }
  0x15   :  { %p461_p9 = scmp.lt.u32.totalorder %s457_s11, %s633_s0 }
  0x17   :  { %p463_p10 = pnand %p461_p9, %p458_p8 }
  0x19   :  { %466 = shalt.err (!%p463_p10)
}
  0x1a   :  { %s467_s16 = scalar_lea.vmem %s19_s8, 256  ;;  %p472_p12 = scmp.lt.s32.totalorder %s19_s8, %s19_s8 }
  0x1b   :  { %p468_p11 = scmp.ne.s32.totalorder %s19_s8, %s467_s16  ;;  %p473_p13 = scmp.lt.s32.totalorder %s467_s16, %s467_s16 }
  0x1d   :  { %p474_p0 = por %p473_p13, %p472_p12 }
  0x1f   :  { %p475_p1 = pnand %p474_p0, %p468_p11 }
  0x21   :  { %478 = shalt.err (!%p475_p1)
}
  0x22   :  { %s533_s1 = smov 128   ;;  %s534_s17 = smov 8  }
  0x23   :  { %24 = dma.hbm_to_vmem [thread:$0]  %s633_s0, 256, %s19_s8, [#allocation3], %s533_s1, %s533_s1, %s534_s17  }
  0x24   :  { %s535_s20 = smov [#allocation7]   ;;  %s479_s24 = scalar_lea.hbm %s636_s3, 4096 }
  0x25   :  { %s44_s21 = sshll.u32 %s535_s20, 4  ;;  %p480_p2 = scmp.ne.s32.totalorder %s636_s3, %s479_s24  ;;  %s45_s21 = int_to_ptr.vmem [resolvable:$true] %s44_s21 }
  0x26   :  { %p483_p3 = scmp.lt.u32.totalorder %s479_s24, %s636_s3 }
  0x28   :  { %p485_p4 = pnand %p483_p3, %p480_p2 }
  0x2a   :  { %488 = shalt.err (!%p485_p4)
}
  0x2b   :  { %s489_s29 = scalar_lea.vmem %s45_s21, 4096  ;;  %p494_p6 = scmp.lt.s32.totalorder %s45_s21, %s45_s21 }
  0x2c   :  { %p490_p5 = scmp.ne.s32.totalorder %s45_s21, %s489_s29  ;;  %p495_p7 = scmp.lt.s32.totalorder %s489_s29, %s489_s29 }
  0x2e   :  { %p496_p8 = por %p495_p7, %p494_p6 }
  0x30   :  { %p497_p9 = pnand %p496_p8, %p490_p5 }
  0x32   :  { %500 = shalt.err (!%p497_p9)
}
  0x33   :  { %50 = dma.hbm_to_vmem [thread:$0]  %s636_s3, 4096, %s45_s21, [#allocation6], %s533_s1, %s533_s1, %s534_s17  }
  0x34   :  { %523 = dma.done.wait [#allocation3], 256  }
  0x35   :  { %524 = vsyncadd [#allocation3], 4294967040 }
  0x36   :  { %525 = dma.done.wait [#allocation6], 8192  }
  0x37   :  { %526 = vsyncadd [#allocation6], 4294959104  ;;  %v536_v0 = vmov 0.0   ;;  %v65_v1 = vld [vmem:[#allocation5 + $0x8] sm:$0xff]  ;;  %v67_v2 = vld [vmem:[#allocation5 + $0x18] sm:$0xff]  ;;  %s537_s8 = smov [#allocation8]  }
  0x38   :  { %172 = vmatprep.mubr.f32.mxu0 %v536_v0  ;;  %v64_v3 = vld [vmem:[#allocation5] sm:$0xff]  ;;  %v362_v4 = vpack.c.bf16 %v67_v2, %v65_v1  ;;  %v66_v5 = vld [vmem:[#allocation5 + $0x10] sm:$0xff]  ;;  %v69_v6 = vld [vmem:[#allocation5 + $0x28] sm:$0xff]  ;;  %s310_s9 = sshll.u32 %s537_s8, 4  ;;  %s311_s9 = int_to_ptr.vmem [resolvable:$true] %s310_s9 }
  0x39   :  { %v71_v7 = vld [vmem:[#allocation5 + $0x38] sm:$0xff]  ;;  %v364_v8 = vpack.c.bf16 %v66_v5, %v64_v3  ;;  %v68_v10 = vld [vmem:[#allocation5 + $0x20] sm:$0xff]  ;;  %v70_v11 = vld [vmem:[#allocation5 + $0x30] sm:$0xff]  ;;  %s501_s10 = scalar_lea.vmem %s311_s9, 256  ;;  %p506_p11 = scmp.lt.s32.totalorder %s311_s9, %s311_s9 }
  0x3a   :  { %v366_v9 = vpack.c.bf16 %v71_v7, %v69_v6  ;;  %v73_v12 = vld [vmem:[#allocation5 + $0x48] sm:$0xff]  ;;  %363 = vmatprep.subr.bf16.mxu0 %v362_v4  ;;  %v75_v13 = vld [vmem:[#allocation5 + $0x58] sm:$0xff]  ;;  %v368_v14 = vpack.c.bf16 %v70_v11, %v68_v10  ;;  %v72_v16 = vld [vmem:[#allocation5 + $0x40] sm:$0xff]  ;;  %p502_p10 = scmp.ne.s32.totalorder %s311_s9, %s501_s10  ;;  %p507_p12 = scmp.lt.s32.totalorder %s501_s10, %s501_s10 }
  0x3b   :  { %365 = vmatpush1.bf16.msra.mxu0 %v364_v8  ;;  %v370_v15 = vpack.c.bf16 %v75_v13, %v73_v12  ;;  %v74_v17 = vld [vmem:[#allocation5 + $0x50] sm:$0xff]  ;;  %v77_v18 = vld [vmem:[#allocation5 + $0x68] sm:$0xff]  ;;  %v79_v19 = vld [vmem:[#allocation5 + $0x78] sm:$0xff] }
  0x3c   :  { %367 = vmatprep.subr.bf16.mxu0 %v366_v9  ;;  %v372_v20 = vpack.c.bf16 %v74_v17, %v72_v16  ;;  %v374_v21 = vpack.c.bf16 %v79_v19, %v77_v18  ;;  %v76_v22 = vld [vmem:[#allocation5 + $0x60] sm:$0xff]  ;;  %v78_v23 = vld [vmem:[#allocation5 + $0x70] sm:$0xff]  ;;  %v81_v24 = vld [vmem:[#allocation5 + $0x88] sm:$0xff]  ;;  %p508_p13 = por %p507_p12, %p506_p11 }
  0x3d   :  { %v83_v25 = vld [vmem:[#allocation5 + $0x98] sm:$0xff]  ;;  %v80_v26 = vld [vmem:[#allocation5 + $0x80] sm:$0xff]  ;;  %v82_v27 = vld [vmem:[#allocation5 + $0x90] sm:$0xff]  ;;  %v376_v30 = vpack.c.bf16 %v78_v23, %v76_v22 }
  0x3e   :  { %v205_v28 = vld [vmem:[#allocation7 + $0x80] sm:$0xff]  ;;  %v206_v29 = vld [vmem:[#allocation7 + $0x88] sm:$0xff]  ;;  %v207_v35 = vld [vmem:[#allocation7 + $0x90] sm:$0xff]  ;;  %v378_v36 = vpack.c.bf16 %v83_v25, %v81_v24  ;;  %v380_v46 = vpack.c.bf16 %v82_v27, %v80_v26  ;;  %p509_p0 = pnand %p508_p13, %p502_p10 }
  0x3f   :  { %369 = vmatpush1.bf16.msra.mxu0 %v368_v14  ;;  %v85_v31 = vld [vmem:[#allocation5 + $0xa8] sm:$0xff]  ;;  %v394_v32 = vpack.c.bf16 %v206_v29, %v205_v28  ;;  %v189_v33 = vld [vmem:[#allocation7] sm:$0xff]  ;;  %v208_v38 = vld [vmem:[#allocation7 + $0x98] sm:$0xff] }
  0x40   :  { %371 = vmatprep.subr.bf16.mxu0 %v370_v15  ;;  %v190_v34 = vld [vmem:[#allocation7 + $0x8] sm:$0xff]  ;;  %v191_v39 = vld [vmem:[#allocation7 + $0x10] sm:$0xff]  ;;  %v192_v40 = vld [vmem:[#allocation7 + $0x18] sm:$0xff]  ;;  %v398_v42 = vpack.c.bf16 %v208_v38, %v207_v35 }
  0x41   :  { %v396_v37 = vpack.c.bf16 %v190_v34, %v189_v33  ;;  %v87_v41 = vld [vmem:[#allocation5 + $0xb8] sm:$0xff]  ;;  %395 = vmatprep.subr.bf16.mxu1 %v394_v32  ;;  %v209_v43 = vld [vmem:[#allocation7 + $0xa0] sm:$0xff]  ;;  %v210_v44 = vld [vmem:[#allocation7 + $0xa8] sm:$0xff]  ;;  %v400_v45 = vpack.c.bf16 %v192_v40, %v191_v39 }
  0x42   :  { %v84_v47 = vld [vmem:[#allocation5 + $0xa0] sm:$0xff]  ;;  %v402_v48 = vpack.c.bf16 %v210_v44, %v209_v43  ;;  %v194_v50 = vld [vmem:[#allocation7 + $0x28] sm:$0xff]  ;;  %v382_v51 = vpack.c.bf16 %v87_v41, %v85_v31  ;;  %v86_v52 = vld [vmem:[#allocation5 + $0xb0] sm:$0xff] }
  0x43   :  { %373 = vmatpush1.bf16.msra.mxu0 %v372_v20  ;;  %397 = vmatpush3.bf16.msra.mxu1 %v396_v37  ;;  %v193_v49 = vld [vmem:[#allocation7 + $0x20] sm:$0xff]  ;;  %v211_v53 = vld [vmem:[#allocation7 + $0xb0] sm:$0xff]  ;;  %v212_v54 = vld [vmem:[#allocation7 + $0xb8] sm:$0xff]  ;;  %v384_v58 = vpack.c.bf16 %v86_v52, %v84_v47 }
  0x44   :  { %375 = vmatprep.subr.bf16.mxu0 %v374_v21  ;;  %399 = vmatprep.subr.bf16.mxu1 %v398_v42  ;;  %v89_v55 = vld [vmem:[#allocation5 + $0xc8] sm:$0xff]  ;;  %v91_v56 = vld [vmem:[#allocation5 + $0xd8] sm:$0xff]  ;;  %v404_v57 = vpack.c.bf16 %v194_v50, %v193_v49  ;;  %v88_v59 = vld [vmem:[#allocation5 + $0xc0] sm:$0xff]  ;;  %v406_v60 = vpack.c.bf16 %v212_v54, %v211_v53 }
  0x45   :  { %v195_v61 = vld [vmem:[#allocation7 + $0x30] sm:$0xff]  ;;  %v196_v62 = vld [vmem:[#allocation7 + $0x38] sm:$0xff]  ;;  %v386_v63 = vpack.c.bf16 %v91_v56, %v89_v55  ;;  %v213_v2 = vld [vmem:[#allocation7 + $0xc0] sm:$0xff] }
  0x46   :  { %v90_v1 = vld [vmem:[#allocation5 + $0xd0] sm:$0xff]  ;;  %v214_v3 = vld [vmem:[#allocation7 + $0xc8] sm:$0xff]  ;;  %v95_v5 = vld [vmem:[#allocation5 + $0xf8] sm:$0xff]  ;;  %v408_v6 = vpack.c.bf16 %v196_v62, %v195_v61 }
  0x47   :  { %377 = vmatpush1.bf16.msra.mxu0 %v376_v30  ;;  %401 = vmatpush3.bf16.msra.mxu1 %v400_v45  ;;  %v93_v4 = vld [vmem:[#allocation5 + $0xe8] sm:$0xff]  ;;  %v388_v7 = vpack.c.bf16 %v90_v1, %v88_v59  ;;  %v92_v8 = vld [vmem:[#allocation5 + $0xe0] sm:$0xff]  ;;  %v410_v9 = vpack.c.bf16 %v214_v3, %v213_v2  ;;  %v94_v13 = vld [vmem:[#allocation5 + $0xf0] sm:$0xff] }
  0x48   :  { %379 = vmatprep.subr.bf16.mxu0 %v378_v36  ;;  %403 = vmatprep.subr.bf16.mxu1 %v402_v48  ;;  %v197_v10 = vld [vmem:[#allocation7 + $0x40] sm:$0xff]  ;;  %v198_v11 = vld [vmem:[#allocation7 + $0x48] sm:$0xff]  ;;  %v390_v12 = vpack.c.bf16 %v95_v5, %v93_v4  ;;  %v215_v14 = vld [vmem:[#allocation7 + $0xd0] sm:$0xff]  ;;  %v392_v17 = vpack.c.bf16 %v94_v13, %v92_v8  ;;  %v98_v36 = vlaneseq }
  0x49   :  { %v216_v15 = vld [vmem:[#allocation7 + $0xd8] sm:$0xff]  ;;  %v412_v16 = vpack.c.bf16 %v198_v11, %v197_v10  ;;  %v199_v19 = vld [vmem:[#allocation7 + $0x50] sm:$0xff]  ;;  %v217_v21 = vld [vmem:[#allocation7 + $0xe0] sm:$0xff] }
  0x4a   :  { %v414_v18 = vpack.c.bf16 %v216_v15, %v215_v14  ;;  %v200_v20 = vld [vmem:[#allocation7 + $0x58] sm:$0xff]  ;;  %v218_v22 = vld [vmem:[#allocation7 + $0xe8] sm:$0xff]  ;;  %v62_v24 = vld [vmem:[#allocation2] sm:$0xff]  ;;  %v99_v37 = vshrl.u32 %v98_v36, 7 }
  0x4b   :  { %381 = vmatpush1.bf16.msra.mxu0 %v380_v46  ;;  %405 = vmatpush3.bf16.msra.mxu1 %v404_v57  ;;  %v416_v23 = vpack.c.bf16 %v200_v20, %v199_v19  ;;  %v418_v25 = vpack.c.bf16 %v218_v22, %v217_v21  ;;  %v63_v26 = vld [vmem:[#allocation2 + $0x8] sm:$0xff]  ;;  %v201_v27 = vld [vmem:[#allocation7 + $0x60] sm:$0xff]  ;;  %v202_v28 = vld [vmem:[#allocation7 + $0x68] sm:$0xff] }
  0x4c   :  { %383 = vmatprep.subr.bf16.mxu0 %v382_v51  ;;  %407 = vmatprep.subr.bf16.mxu1 %v406_v60  ;;  %v420_v29 = vpack.c.bf16 %v202_v28, %v201_v27  ;;  %v219_v30 = vld [vmem:[#allocation7 + $0xf0] sm:$0xff]  ;;  %v220_v31 = vld [vmem:[#allocation7 + $0xf8] sm:$0xff]  ;;  %v100_v38 = vsub.s32 0, %v99_v37  ;;  %v104_v39 = vsub.s32 1, %v99_v37 }
  0x4d   :  { %v422_v32 = vpack.c.bf16 %v220_v31, %v219_v30  ;;  %v203_v33 = vld [vmem:[#allocation7 + $0x70] sm:$0xff]  ;;  %v204_v34 = vld [vmem:[#allocation7 + $0x78] sm:$0xff] }
  0x4e   :  { %v424_v35 = vpack.c.bf16 %v204_v34, %v203_v33  ;;  %v323_v55 = vld [vmem:[%s637_s4] ss:$0 sm:$0xff] }
  0x4f   :  { %385 = vmatpush1.bf16.msra.mxu0 %v384_v58  ;;  %409 = vmatpush3.bf16.msra.mxu1 %v408_v6 }
  0x50   :  { %387 = vmatprep.subr.bf16.mxu0 %v386_v63  ;;  %411 = vmatprep.subr.bf16.mxu1 %v410_v9 }
  0x53   :  { %389 = vmatpush1.bf16.msra.mxu0 %v388_v7  ;;  %413 = vmatpush3.bf16.msra.mxu1 %v412_v16 }
  0x54   :  { %391 = vmatprep.subr.bf16.mxu0 %v390_v12  ;;  %415 = vmatprep.subr.bf16.mxu1 %v414_v18 }
  0x57   :  { %393 = vmatpush1.bf16.msra.mxu0 %v392_v17  ;;  %417 = vmatpush3.bf16.msra.mxu1 %v416_v23 }
  0x58   :  { %419 = vmatprep.subr.bf16.mxu1 %v418_v25 }
  0x5a   :  { %173 = vmatmul.mubr.f32.vlgmr.msra.gmra.mrb[0].mxu0 %v62_v24 }
  0x5b   :  { %178 = vmatprep.mubr.f32.mxu0 %v536_v0  ;;  %421 = vmatpush3.bf16.msra.mxu1 %v420_v29  ;;  %v96_v0 = vld [vmem:[%s635_s2] sm:$0x3] }
  0x5c   :  { %423 = vmatprep.subr.bf16.mxu1 %v422_v32  ;;  %v101_v40 = vrot.slane %v96_v0, %v100_v38  ;;  %v105_v41 = vrot.slane %v96_v0, %v104_v39 }
  0x5e   :  { %179 = vmatmul.mubr.f32.gmra.mrb[2].mxu0 %v63_v26 }
  0x5f   :  { %425 = vmatpush3.bf16.msra.mxu1 %v424_v35 }
 0x12d   :  { %v174_v42 = vpop.f32.mrb[0].mxu0 }
 0x12e   :  { %v175_v43 = vadd.f32 %v174_v42, %v101_v40  ;;  %v176_v44 = vpop.f32.mrb[1].mxu0 }
 0x12f   :  { %v177_v45 = vadd.f32 %v176_v44, %v105_v41 }
 0x130   :  { %v185_v48 = vmax.f32 %v175_v43, 0.0 }
 0x131   :  { %v180_v46 = vpop.f32.mrb[2].mxu0  ;;  %v186_v47 = vmax.f32 %v177_v45, 0.0 }
 0x132   :  { %v181_v49 = vadd.f32 %v180_v46, %v101_v40  ;;  %v182_v50 = vpop.f32.mrb[3].mxu0 }
 0x133   :  { %v183_v51 = vadd.f32 %v182_v50, %v105_v41  ;;  %292 = vmatprep.mubr.f32.mxu1 %v186_v47 }
 0x134   :  { %293 = vmatmul.mubr.f32.vlgmr.msra.gmra.mrb[0].mxu1 %v185_v48  ;;  %v187_v53 = vmax.f32 %v181_v49, 0.0 }
 0x135   :  { %v188_v52 = vmax.f32 %v183_v51, 0.0 }
 0x137   :  { %297 = vmatprep.mubr.f32.mxu1 %v188_v52 }
 0x138   :  { %298 = vmatmul.mubr.f32.gmra.mrb[2].mxu1 %v187_v53 }
 0x207   :  { %v356_v54 = vpop.f32.mrb[0].mxu1 }
 0x208   :  { %v357_v56 = vpop.f32.mrb[1].mxu1 }
 0x209   :  { %v358_v57 = vadd.f32 %v357_v56, %v356_v54 }
 0x20b   :  { %v295_v58 = vadd.f32 %v358_v57, %v323_v55  ;;  %v359_v59 = vpop.f32.mrb[2].mxu1 }
 0x20c   :  { %v360_v60 = vpop.f32.mrb[3].mxu1 }
 0x20d   :  { %303 = vst [vmem:[#allocation8] sm:$0xff] %v295_v58  ;;  %v361_v61 = vadd.f32 %v360_v60, %v359_v59 }
 0x20f   :  { %v300_v62 = vadd.f32 %v361_v61, %v323_v55 }
 0x211   :  { %304 = vst [vmem:[#allocation8 + $0x8] sm:$0xff] %v300_v62 }
 0x212   :  { %512 = shalt.err (!%p509_p0)
}
 0x213   :  { %s513_s12 = scalar_lea.hbm %s638_s5, 256 }
 0x214   :  { %p514_p1 = scmp.ne.s32.totalorder %s638_s5, %s513_s12  ;;  %p517_p2 = scmp.lt.u32.totalorder %s513_s12, %s638_s5 }
 0x216   :  { %p519_p3 = pnand %p517_p2, %p514_p1 }
 0x218   :  { %522 = shalt.err (!%p519_p3)
}
 0x219   :  { %316 = dma.vmem_to_hbm [thread:$0]  %s311_s9, 256, %s638_s5, [#allocation4], %s533_s1, %s533_s1, %s534_s17  }
 0x21a   :  { %527 = dma.done.wait [#allocation4], 256  }
 0x21b   :  { %528 = vsyncadd [#allocation4], 4294967040 }
 0x21c   :  { %320 = vsyncpa [#allocation3], 1 }
 0x21d   :  { %321 = vsyncpa [#allocation6], 1 }
 0x21e   :  { %322 = vsyncpa [#allocation4], 1 }

</bundles_post_ra>
